<compile_context>
chip_gen: v6e
topology: v6e:2x2x1
jax: 0.10.0
libtpu: 0.0.40
codegen_flags: <defaults>
</compile_context>

<pallas_src>
import jax
import jax.numpy as jnp
import numpy as np
from jax.experimental import pallas as pl
from jax.experimental.pallas import tpu as pltpu


def _round_up(x, m):
    return ((x + m - 1) // m) * m


def _mlp_bil_kernel(xi_ref, xj_ref, *refs):
    """Shared-weight MLP + bilinear score, transposed (feature-on-sublane) dataflow.

    xi_ref, xj_ref : [C, tm]   (features on sublanes, batch rows on lanes)
    refs = (w0, b0, w1, b1, ..., w_{L-1}, b_{L-1}, w_bil, out_ref)
      w_l   : [out_l, in_l]    original PyTorch layout (bf16)
      b_l   : [out_l, 1]       float32
      w_bil : [H, H]           original PyTorch layout (bf16)
      out   : [1, tm]          float32 scores (lane-dense row)
    """
    *param_refs, out_ref = refs
    wb_ref = param_refs[-1]
    lin_refs = param_refs[:-1]
    num_layers = len(lin_refs) // 2

    hi = xi_ref[...]                                          # [C, tm]
    hj = xj_ref[...]                                          # [C, tm]

    for l in range(num_layers):
        w = lin_refs[2 * l][...]                              # [out, in]
        b = lin_refs[2 * l + 1][...]                          # [out, 1] f32
        # (x @ W^T)^T == W @ x^T : no weight transpose needed in this layout.
        hi = jnp.maximum(
            jnp.dot(w, hi.astype(w.dtype),
                    preferred_element_type=jnp.float32) + b, 0.0)
        hj = jnp.maximum(
            jnp.dot(w, hj.astype(w.dtype),
                    preferred_element_type=jnp.float32) + b, 0.0)
        # TODO(synk): dropout omitted (module in eval mode -> F.dropout is the
        # identity); pltpu.prng_seed + pltpu.stateful_bernoulli could add a
        # mask here if training-mode dropout is ever required.

    wb = wb_ref[...]                                          # [H, H]
    # (x_i @ Wb^T)^T == Wb @ x_i^T
    bilin = jnp.dot(wb, hi.astype(wb.dtype),
                    preferred_element_type=jnp.float32)       # [H, tm] f32
    prod = bilin * hj                                         # [H, tm] f32
    # Sublane (XLU) reduction over the hidden dim -> lane-dense [1, tm] row,
    # kept in f32 and off the MXU critical path; stored with full vector
    # stores (no masked lane-width-1 writes, no transposes).
    out_ref[...] = jnp.sum(prod, axis=0, keepdims=True).astype(out_ref.dtype)


def mlp_bil_predictor(x_i, x_j, lin_weights, lin_biases, bilin_weight, *,
                      tm=4096, param_dtype=jnp.bfloat16):
    """Wrapper around the Pallas kernel.

    Args:
      x_i, x_j:      [N, in_channels]
      lin_weights:   list of PyTorch-layout weights [out_f, in_f]
      lin_biases:    list of biases [out_f]
      bilin_weight:  PyTorch-layout [hidden, hidden]
      tm:            batch tile (multiple of 128 lanes).  Capped so there are
                     at least two grid tiles whenever N allows (v7x megacore).
      param_dtype:   MXU operand dtype (default bf16; accumulation stays f32).
    Returns:
      [N] float32 scores.
    """
    x_i = jnp.asarray(x_i)
    x_j = jnp.asarray(x_j)
    N, in_c = x_i.shape

    # Row tile: multiple of 128; large by default to amortize per-grid-step
    # overhead (transposed [C, tm] tiles are tiny in VMEM), but capped so the
    # "parallel" grid axis has >= 2 steps to feed both v7x TensorCores.
    tm = _round_up(max(tm, 128), 128)
    tm = min(tm, max(_round_up(pl.cdiv(N, 2), 128), 128))
    n_pad = _round_up(N, tm)
    num_tiles = n_pad // tm

    # Transposed inputs [C, n_pad] in the compute dtype; zero pad-columns are
    # computed (cheaply) and sliced off at the end.
    def prep(x):
        xt = x.astype(param_dtype).T
        if n_pad != N:
            xt = jnp.pad(xt, ((0, 0), (0, n_pad - N)))
        return xt

    xi_t, xj_t = prep(x_i), prep(x_j)

    # Weights stay in the PyTorch [out, in] layout (the transposed dataflow
    # computes W @ h, so no pre-transpose); biases are [out, 1] f32.
    ws = [jnp.asarray(w, param_dtype) for w in lin_weights]
    bs = [jnp.asarray(b, jnp.float32).reshape(-1, 1) for b in lin_biases]
    wb = jnp.asarray(bilin_weight, param_dtype)

    params, param_specs = [], []
    for w, b in zip(ws, bs):
        params += [w, b]
        # Constant block index -> Pallas revisits the resident VMEM block and
        # does not re-issue the weight/bias DMA per grid step.
        param_specs += [
            pl.BlockSpec(w.shape, lambda i: (0, 0)),
            pl.BlockSpec(b.shape, lambda i: (0, 0)),
        ]
    params.append(wb)
    param_specs.append(pl.BlockSpec(wb.shape, lambda i: (0, 0)))

    out = pl.pallas_call(
        _mlp_bil_kernel,
        out_shape=jax.ShapeDtypeStruct((1, n_pad), jnp.float32),
        grid_spec=pltpu.PrefetchScalarGridSpec(
            num_scalar_prefetch=0,
            grid=(num_tiles,),
            in_specs=[
                pl.BlockSpec((in_c, tm), lambda i: (0, i)),
                pl.BlockSpec((in_c, tm), lambda i: (0, i)),
            ] + param_specs,
            out_specs=pl.BlockSpec((1, tm), lambda i: (0, i)),
        ),
        compiler_params=pltpu.CompilerParams(
            dimension_semantics=("parallel",)),
    )(xi_t, xj_t, *params)

    return out[0, :N]


def _reference(x_i, x_j, lin_weights, lin_biases, bilin_weight):
    hi = x_i.astype(jnp.float32)
    hj = x_j.astype(jnp.float32)
    for w, b in zip(lin_weights, lin_biases):
        hi = jax.nn.relu(hi @ w.T + b)
        hj = jax.nn.relu(hj @ w.T + b)
    return jnp.sum((hi @ bilin_weight.T) * hj, axis=-1)


if __name__ == "__main__":
    # Module config: in_channels=16, hidden_channels=32, num_layers=2, dropout=0.0
    in_channels, hidden_channels, num_layers = 16, 32, 2
    N = 300  # deliberately NOT a multiple of 128 to exercise the padding path

    key = jax.random.PRNGKey(0)
    keys = jax.random.split(key, 2 + 2 * num_layers + 1)

    x_i = jax.random.normal(keys[0], (N, in_channels), jnp.float32)
    x_j = jax.random.normal(keys[1], (N, in_channels), jnp.float32)

    # Deterministic parameter init (PyTorch Linear shapes: W=[out, in], b=[out]).
    lin_weights, lin_biases = [], []
    fan_in = in_channels
    for l in range(num_layers):
        kw, kb = keys[2 + 2 * l], keys[3 + 2 * l]
        bound = 1.0 / np.sqrt(fan_in)
        lin_weights.append(
            jax.random.uniform(kw, (hidden_channels, fan_in), jnp.float32,
                               -bound, bound))
        lin_biases.append(
            jax.random.uniform(kb, (hidden_channels,), jnp.float32,
                               -bound, bound))
        fan_in = hidden_channels

    bound = 1.0 / np.sqrt(hidden_channels)
    bilin_weight = jax.random.uniform(
        keys[-1], (hidden_channels, hidden_channels), jnp.float32,
        -bound, bound)

    out = mlp_bil_predictor(x_i, x_j, lin_weights, lin_biases, bilin_weight)
    out = jax.block_until_ready(out)

    ref = _reference(x_i, x_j, lin_weights, lin_biases, bilin_weight)
    # bf16 MXU operands (f32 accumulation) -> compare against the exact f32
    # reference at a bf16-appropriate tolerance.
    np.testing.assert_allclose(np.asarray(out), np.asarray(ref),
                               rtol=5e-2, atol=5e-2)
    print("KERNEL_OK")
</pallas_src>

<mosaic_0001>
module attributes {stable_mosaic.version = 11 : i64} {
  func.func @_mlp_bil_kernel(%arg0: i32, %arg1: memref<16x256xbf16, #tpu.memory_space<vmem>>, %arg2: memref<16x256xbf16, #tpu.memory_space<vmem>>, %arg3: memref<32x16xbf16, #tpu.memory_space<vmem>>, %arg4: memref<32x1xf32, #tpu.memory_space<vmem>>, %arg5: memref<32x32xbf16, #tpu.memory_space<vmem>>, %arg6: memref<32x1xf32, #tpu.memory_space<vmem>>, %arg7: memref<32x32xbf16, #tpu.memory_space<vmem>>, %arg8: memref<1x256xf32, #tpu.memory_space<vmem>>) attributes {dimension_semantics = [#tpu.dimension_semantics<parallel>], iteration_bounds = array<i64: 2>, scalar_prefetch = 0 : i64, scratch_operands = 0 : i64, tpu.core_type = #tpu.core_type<tc>, window_params = [{transform_indices = @transform_0, window_bounds = array<i64: 16, 256>}, {transform_indices = @transform_1, window_bounds = array<i64: 16, 256>}, {pipeline_mode = #tpu.pipeline_mode<synchronous>, transform_indices = @transform_2, window_bounds = array<i64: 32, 16>}, {pipeline_mode = #tpu.pipeline_mode<synchronous>, transform_indices = @transform_3, window_bounds = array<i64: 32, 1>}, {pipeline_mode = #tpu.pipeline_mode<synchronous>, transform_indices = @transform_4, window_bounds = array<i64: 32, 32>}, {pipeline_mode = #tpu.pipeline_mode<synchronous>, transform_indices = @transform_5, window_bounds = array<i64: 32, 1>}, {pipeline_mode = #tpu.pipeline_mode<synchronous>, transform_indices = @transform_6, window_bounds = array<i64: 32, 32>}, {transform_indices = @transform_7, window_bounds = array<i64: 1, 256>}]} {
    %c0 = arith.constant 0 : index
    %c0_0 = arith.constant 0 : index
    %0 = vector.load %arg1[%c0, %c0_0] : memref<16x256xbf16, #tpu.memory_space<vmem>>, vector<16x256xbf16>
    %c0_1 = arith.constant 0 : index
    %c0_2 = arith.constant 0 : index
    %1 = vector.load %arg2[%c0_1, %c0_2] : memref<16x256xbf16, #tpu.memory_space<vmem>>, vector<16x256xbf16>
    %c0_3 = arith.constant 0 : index
    %c0_4 = arith.constant 0 : index
    %2 = vector.load %arg3[%c0_3, %c0_4] : memref<32x16xbf16, #tpu.memory_space<vmem>>, vector<32x16xbf16>
    %c0_5 = arith.constant 0 : index
    %c0_6 = arith.constant 0 : index
    %3 = vector.load %arg4[%c0_5, %c0_6] : memref<32x1xf32, #tpu.memory_space<vmem>>, vector<32x1xf32>
    %cst = arith.constant dense<0.000000e+00> : vector<32x256xf32>
    %4 = tpu.matmul %2, %0, %cst {dimension_numbers = #tpu.dot_dimension_numbers<[1], [0], [0], [1], [0, 0, 1, 1], [], []>} : vector<32x16xbf16>, vector<16x256xbf16>, vector<32x256xf32> -> vector<32x256xf32>
    %5 = vector.broadcast %3 : vector<32x1xf32> to vector<32x256xf32>
    %6 = arith.addf %4, %5 : vector<32x256xf32>
    %cst_7 = arith.constant 0.000000e+00 : f32
    %7 = vector.broadcast %cst_7 : f32 to vector<32x256xf32>
    %8 = arith.maximumf %6, %7 : vector<32x256xf32>
    %cst_8 = arith.constant dense<0.000000e+00> : vector<32x256xf32>
    %9 = tpu.matmul %2, %1, %cst_8 {dimension_numbers = #tpu.dot_dimension_numbers<[1], [0], [0], [1], [0, 0, 1, 1], [], []>} : vector<32x16xbf16>, vector<16x256xbf16>, vector<32x256xf32> -> vector<32x256xf32>
    %10 = vector.broadcast %3 : vector<32x1xf32> to vector<32x256xf32>
    %11 = arith.addf %9, %10 : vector<32x256xf32>
    %cst_9 = arith.constant 0.000000e+00 : f32
    %12 = vector.broadcast %cst_9 : f32 to vector<32x256xf32>
    %13 = arith.maximumf %11, %12 : vector<32x256xf32>
    %c0_10 = arith.constant 0 : index
    %c0_11 = arith.constant 0 : index
    %14 = vector.load %arg5[%c0_10, %c0_11] : memref<32x32xbf16, #tpu.memory_space<vmem>>, vector<32x32xbf16>
    %c0_12 = arith.constant 0 : index
    %c0_13 = arith.constant 0 : index
    %15 = vector.load %arg6[%c0_12, %c0_13] : memref<32x1xf32, #tpu.memory_space<vmem>>, vector<32x1xf32>
    %16 = arith.truncf %8 : vector<32x256xf32> to vector<32x256xbf16>
    %cst_14 = arith.constant dense<0.000000e+00> : vector<32x256xf32>
    %17 = tpu.matmul %14, %16, %cst_14 {dimension_numbers = #tpu.dot_dimension_numbers<[1], [0], [0], [1], [0, 0, 1, 1], [], []>} : vector<32x32xbf16>, vector<32x256xbf16>, vector<32x256xf32> -> vector<32x256xf32>
    %18 = vector.broadcast %15 : vector<32x1xf32> to vector<32x256xf32>
    %19 = arith.addf %17, %18 : vector<32x256xf32>
    %cst_15 = arith.constant 0.000000e+00 : f32
    %20 = vector.broadcast %cst_15 : f32 to vector<32x256xf32>
    %21 = arith.maximumf %19, %20 : vector<32x256xf32>
    %22 = arith.truncf %13 : vector<32x256xf32> to vector<32x256xbf16>
    %cst_16 = arith.constant dense<0.000000e+00> : vector<32x256xf32>
    %23 = tpu.matmul %14, %22, %cst_16 {dimension_numbers = #tpu.dot_dimension_numbers<[1], [0], [0], [1], [0, 0, 1, 1], [], []>} : vector<32x32xbf16>, vector<32x256xbf16>, vector<32x256xf32> -> vector<32x256xf32>
    %24 = vector.broadcast %15 : vector<32x1xf32> to vector<32x256xf32>
    %25 = arith.addf %23, %24 : vector<32x256xf32>
    %cst_17 = arith.constant 0.000000e+00 : f32
    %26 = vector.broadcast %cst_17 : f32 to vector<32x256xf32>
    %27 = arith.maximumf %25, %26 : vector<32x256xf32>
    %c0_18 = arith.constant 0 : index
    %c0_19 = arith.constant 0 : index
    %28 = vector.load %arg7[%c0_18, %c0_19] : memref<32x32xbf16, #tpu.memory_space<vmem>>, vector<32x32xbf16>
    %29 = arith.truncf %21 : vector<32x256xf32> to vector<32x256xbf16>
    %cst_20 = arith.constant dense<0.000000e+00> : vector<32x256xf32>
    %30 = tpu.matmul %28, %29, %cst_20 {dimension_numbers = #tpu.dot_dimension_numbers<[1], [0], [0], [1], [0, 0, 1, 1], [], []>} : vector<32x32xbf16>, vector<32x256xbf16>, vector<32x256xf32> -> vector<32x256xf32>
    %31 = arith.mulf %30, %27 : vector<32x256xf32>
    %cst_21 = arith.constant dense<0.000000e+00> : vector<256xf32>
    %32 = vector.multi_reduction <add>, %31, %cst_21 [0] : vector<32x256xf32> to vector<256xf32>
    %33 = vector.shape_cast %32 : vector<256xf32> to vector<1x256xf32>
    %c0_22 = arith.constant 0 : index
    %c0_23 = arith.constant 0 : index
    %34 = vector.load %arg8[%c0_22, %c0_23] : memref<1x256xf32, #tpu.memory_space<vmem>>, vector<1x256xf32>
    tpu.vector_store %arg8[%c0_22, %c0_23], %33 {strides = array<i32>} : memref<1x256xf32, #tpu.memory_space<vmem>>, vector<1x256xf32>,
    return
  }
  func.func @transform_0(%arg0: i32) -> (i32, i32) {
    %c0_i32 = arith.constant 0 : i32
    %c0_i32_0 = arith.constant 0 : i32
    return %c0_i32, %arg0 : i32, i32
  }
  func.func @transform_1(%arg0: i32) -> (i32, i32) {
    %c0_i32 = arith.constant 0 : i32
    %c0_i32_0 = arith.constant 0 : i32
    return %c0_i32, %arg0 : i32, i32
  }
  func.func @transform_2(%arg0: i32) -> (i32, i32) {
    %c0_i32 = arith.constant 0 : i32
    %c0_i32_0 = arith.constant 0 : i32
    %c0_i32_1 = arith.constant 0 : i32
    return %c0_i32, %c0_i32_0 : i32, i32
  }
  func.func @transform_3(%arg0: i32) -> (i32, i32) {
    %c0_i32 = arith.constant 0 : i32
    %c0_i32_0 = arith.constant 0 : i32
    %c0_i32_1 = arith.constant 0 : i32
    return %c0_i32, %c0_i32_0 : i32, i32
  }
  func.func @transform_4(%arg0: i32) -> (i32, i32) {
    %c0_i32 = arith.constant 0 : i32
    %c0_i32_0 = arith.constant 0 : i32
    %c0_i32_1 = arith.constant 0 : i32
    return %c0_i32, %c0_i32_0 : i32, i32
  }
  func.func @transform_5(%arg0: i32) -> (i32, i32) {
    %c0_i32 = arith.constant 0 : i32
    %c0_i32_0 = arith.constant 0 : i32
    %c0_i32_1 = arith.constant 0 : i32
    return %c0_i32, %c0_i32_0 : i32, i32
  }
  func.func @transform_6(%arg0: i32) -> (i32, i32) {
    %c0_i32 = arith.constant 0 : i32
    %c0_i32_0 = arith.constant 0 : i32
    %c0_i32_1 = arith.constant 0 : i32
    return %c0_i32, %c0_i32_0 : i32, i32
  }
  func.func @transform_7(%arg0: i32) -> (i32, i32) {
    %c0_i32 = arith.constant 0 : i32
    %c0_i32_0 = arith.constant 0 : i32
    return %c0_i32, %arg0 : i32, i32
  }
}

</mosaic_0001>

<bundles_post_ra>
// kernel: tpu_custom_call.1
= control target key start
LH: loop header
LB: loop body
LE: loop exit
PB: predicated region body
PF: predicated region fallthrough
CT: control target
= control target key end

     0   :  { %12 = vsyncpa [#allocation5], 0  ;;  %s1354_s0 = inlined_call_operand.vmem [shape: bf16[16,512], index: 0, kind: input, shape index: {}]   ;;  %s1355_s1 = inlined_call_operand.vmem [shape: bf16[16,512], index: 1, kind: input, shape index: {}]   ;;  %s1356_s2 = inlined_call_operand.vmem [shape: bf16[32,16], index: 2, kind: input, shape index: {}]   ;;  %s1357_s3 = inlined_call_operand.vmem [shape: f32[32,1], index: 3, kind: input, shape index: {}]   ;;  %s1358_s4 = inlined_call_operand.vmem [shape: bf16[32,32], index: 4, kind: input, shape index: {}]   ;;  %s1359_s5 = inlined_call_operand.vmem [shape: f32[32,1], index: 5, kind: input, shape index: {}]   ;;  %s1360_s6 = inlined_call_operand.vmem [shape: bf16[32,32], index: 6, kind: input, shape index: {}]   ;;  %s1361_s7 = inlined_call_operand.hbm [shape: f32[1,512], index: 7, kind: output, shape index: {}]  }
   0x1   :  { %14 = vsyncpa [#allocation5 + $0x1], 0  ;;  %s1174_s24 = smov 0   ;;  %s1176_s25 = smov 0  }
   0x2   :  { %s1178_s26 = smov 0   ;;  %s1180_s27 = smov 0  }
   0x3 LB: > { %s970_s28 = sadd.s32 4294967295, %s1129_s27   ;;  %s971_s29 = sadd.s32 4294967294, %s1129_s27   ;;  %s1129_s27 = sphi %s1180_s27, %s1370_s27   ;;  %s1125_s26 = sphi %s1178_s26, %s1369_s26   ;;  %s1121_s25 = sphi %s1176_s25, %s1368_s25   ;;  %s1117_s24 = sphi %s1174_s24, %s1367_s24  }
   0x4   : > { %s1197_s30 = sadd.s32 1, %s1129_s27   ;;  %s27_s8 = sadd.s32 1, %s1125_s26 }
   0x5   : > { %s24_s9 = ssub.s32 %s1129_s27, %s1197_s30  ;;  %p34_p0 = scmp.ne.s32.totalorder %s1125_s26, %s1121_s25 }
   0x6   : > { %p25_p1 = scmp.eq.s32.totalorder %s24_s9, 0  ;;  %p35_p2 = scmp.eq.s32.totalorder %s1129_s27, 0 }
   0x7   : > { %p195_p3 = scmp.eq.s32.totalorder %s970_s28, 1  ;;  %p200_p4 = scmp.ne.s32.totalorder %s1121_s25, %s1117_s24 }
   0x8   : > { %s1210_s10 = scalar_select %p25_p1, %s1125_s26, %s27_s8  }
   0x9   : > { %p1212_p5 = por %p35_p2, %p34_p0  ;;  %p1216_p6 = por %p195_p3, %p34_p0 }
   0xa   : > { %p201_p7 = scmp.eq.s32.totalorder %s971_s29, 1  ;;  %p1362_p9 = scmp.ge.s32.totalorder %s1129_s27, 2 }
   0xc   : > { %p1220_p8 = por %p201_p7, %p200_p4  ;;  %232 = sbr.rel (%p1362_p9) target bundleno = 27 (0x1b), region = 36 }
  0x11   : > { %235 = sbr.rel (!%p1212_p5) target bundleno = 22 (0x16), region = 40  ;;  %s237_s14 = sand.u32 (%p1212_p5), 1, %s1125_s26  }
  0x12   : > { %s1009_s15 = sshll.u32 (%p1212_p5), %s1129_s27, 3  ;;  %s974_s16 = sshll.u32 (%p1212_p5), %s237_s14, 4 }
  0x13   : > { %s242_s19 = scalar_lea.vmem (%p1212_p5), %s1354_s0, %s1009_s15  ;;  %s239_s20 = scalar_lea.vmem (%p1212_p5), [#allocation2], %s974_s16 }
  0x14   : > { %v273_v0 = vld [vmem:[%s242_s19] sm:$0xff] (%p1212_p5)  ;;  %v275_v1 = vld [vmem:[%s242_s19 + $0x10] sm:$0xff] (%p1212_p5) }
  0x15   : > { %274 = vst [vmem:[%s239_s20] sm:$0xff] (%p1212_p5), %v273_v0  ;;  %276 = vst [vmem:[%s239_s20 + $0x8] sm:$0xff] (%p1212_p5), %v275_v1 }
  0x16 PF: > { %282 = sbr.rel (!%p1212_p5) target bundleno = 27 (0x1b), region = 78  ;;  %s284_s21 = sand.u32 (%p1212_p5), 1, %s1125_s26  }
  0x17   : > { %s1010_s22 = sshll.u32 (%p1212_p5), %s1129_s27, 3  ;;  %s977_s23 = sshll.u32 (%p1212_p5), %s284_s21, 4 }
  0x18   : > { %s289_s9 = scalar_lea.vmem (%p1212_p5), %s1355_s1, %s1010_s22  ;;  %s286_s14 = scalar_lea.vmem (%p1212_p5), [#allocation3], %s977_s23 }
  0x19   : > { %v320_v2 = vld [vmem:[%s289_s9] sm:$0xff] (%p1212_p5)  ;;  %v322_v3 = vld [vmem:[%s289_s9 + $0x10] sm:$0xff] (%p1212_p5) }
  0x1a   : > { %321 = vst [vmem:[%s286_s14] sm:$0xff] (%p1212_p5), %v320_v2  ;;  %323 = vst [vmem:[%s286_s14 + $0x8] sm:$0xff] (%p1212_p5), %v322_v3 }
  0x1b PF: > { %p980_p10 = scmp.ge.s32.totalorder %s1129_s27, 1  ;;  %p328_p11 = scmp.lt.s32.totalorder %s1129_s27, 3 }
  0x1d   : > { %p329_p12 = pnand %p980_p10, %p328_p11 }
  0x1e   : > { %s1244_s11 = sand.u32 (!%p329_p12), 1, %s1121_s25   ;;  %s1011_s21 = sshll.u32 (!%p329_p12), %s970_s28, 5 }
  0x1f   : > { %332 = sbr.rel (%p329_p12) target bundleno = 720 (0x2d0), region = 116  ;;  %s981_s15 = sshll.u32 (!%p329_p12), %s1244_s11, 4 }
  0x20   : > { %s337_s20 = scalar_lea.vmem (!%p329_p12), [#allocation2], %s981_s15  ;;  %s344_s23 = scalar_lea.vmem (!%p329_p12), [#allocation3], %s981_s15 }
  0x21   : > { %s886_s9 = scalar_lea.hbm (!%p329_p12), %s1361_s7, %s1011_s21  ;;  %s874_s14 = scalar_lea.sflag (!%p329_p12), [#allocation5], %s1244_s11 }
  0x22   : > { %s1133_s17 = smov (!%p329_p12), [#allocation4]  }
  0x23   : > { %s1073_s15 = sshll.u32 (!%p329_p12), %s1133_s17, 4  ;;  %s1074_s15 = int_to_ptr.vmem [resolvable:$false] %s1073_s15 }
  0x24   : > { %v1131_v4 = vmov 0   ;;  %v391_v5 = vld [vmem:[%s1357_s3 + $0x10] sm:$0xff]  ;;  %v392_v6 = vld [vmem:[%s1357_s3 + $0x18] sm:$0xff]  ;;  %v1060_v8 = vld [vmem:[%s1356_s2] sm:$0xff]   ;;  %vm433_vm0 = vcmask 130048   ;;  %vm614_vm1 = vcmask 261120  }
  0x25   : > { %472 = vmatprep.mubr.bf16.mxu0 %v1131_v4  ;;  %482 = vmatprep.mubr.bf16.mxu1 %v1131_v4  ;;  %v1057_v7 = vld [vmem:[%s337_s20 + $0x4] ss:$8 sps:$4 sm:$0xff]   ;;  %v1059_v9 = vld [vmem:[%s337_s20] ss:$8 sps:$4 sm:$0xff]   ;;  %s983_s20 = sshll.u32 %s1244_s11, 1  ;;  %s1075_s28 = scalar_lea.vmem %s1074_s15, 64 }
  0x26   : > { %1055 = vset.pattern.permute.xlu0 %v1131_v4  ;;  %1056 = vset.pattern.permute.xlu1 %v1131_v4  ;;  %v1061_v10 = vld [vmem:[%s1356_s2 + $0x8] sm:$0xff]   ;;  %v389_v12 = vld [vmem:[%s1357_s3] sm:$0xff]  ;;  %v578_v14 = vld [vmem:[%s1359_s5 + $0x10] sm:$0xff]  ;;  %s376_s22 = scalar_lea.vmem [#allocation4], %s983_s20 }
  0x27   : > { %405 = vperm.xlu0 %1055, %v391_v5   ;;  %454 = vmatprep.subr.bf16.mxu0 %v1057_v7  ;;  %v1064_v11 = vld [vmem:[%s344_s23 + $0x4] ss:$8 sps:$4 sm:$0xff]   ;;  %v1062_v13 = vld [vmem:[%s344_s23] ss:$8 sps:$4 sm:$0xff]   ;;  %s888_s23 = sshll.u32 %s376_s22, 4  ;;  %s889_s23 = int_to_ptr.vmem [resolvable:$true] %s888_s23 }
  0x28   : > { %1012 = vmatprep.subr.bf16.mxu1 %v1057_v7  ;;  %455 = vmatpush1.bf16.msra.mxu0 %v1059_v9  ;;  %v390_v15 = vld [vmem:[%s1357_s3 + $0x8] sm:$0xff]  ;;  %v576_v16 = vld [vmem:[%s1359_s5] sm:$0xff]  ;;  %v579_v17 = vld [vmem:[%s1359_s5 + $0x18] sm:$0xff]  ;;  %s1069_s16 = scalar_lea.vmem %s889_s23, 32  ;;  %p1076_p2 = scmp.lt.s32.totalorder %s889_s23, %s1074_s15 }
  0x29   : > { %1013 = vmatpush1.bf16.msra.mxu1 %v1059_v9  ;;  %395 = vperm.xlu1 %1056, %v389_v12   ;;  %v577_v18 = vld [vmem:[%s1359_s5 + $0x8] sm:$0xff]  ;;  %v1065_v56 = vld [vmem:[%s1358_s4] sm:$0xff]   ;;  %p1070_p13 = scmp.ne.s32.totalorder %s889_s23, %s1069_s16  ;;  %p1077_p3 = scmp.lt.s32.totalorder %s1075_s28, %s1069_s16 }
  0x2a   : > { %525 = vmatprep.subr.bf16.mxu1 %v1064_v11 }
  0x2b   : > { %410 = vperm.xlu0 %1055, %v392_v6   ;;  %988 = vmatmul.mubr.msk.bf16.vlgmr.msra.gmra.mxu0 %vm433_vm0, %v1060_v8  ;;  %p1071_p0 = pnand %p1070_p13, %p1216_p6  ;;  %p1078_p4 = por %p1077_p3, %p1076_p2 }
  0x2c   : > { %989 = vmatmul.mubr.msk.bf16.vlgmr.msra.gmra.mxu1 %vm433_vm0, %v1061_v10  ;;  %653 = vmatprep.mubr.bf16.mxu0 %v1131_v4 }
  0x2d   : > { %526 = vmatpush1.bf16.msra.mxu1 %v1062_v13  ;;  %543 = vmatprep.mubr.bf16.mxu1 %v1131_v4  ;;  %p1072_p1 = pneg %p1071_p0 }
  0x2e   : > { %400 = vperm.xlu1 %1056, %v390_v15  }
  0x2f   : > { %596 = vperm.xlu0 %1055, %v578_v14   ;;  %p1079_p5 = pnand %p1078_p4, %p1072_p1 }
  0x32   : > { %601 = vperm.xlu1 %1056, %v579_v17  }
  0x33   : > { %586 = vperm.xlu0 %1055, %v576_v16  }
  0x34   : > { %992 = vmatmul.mubr.msk.bf16.vlgmr.msra.gmra.mxu1 %vm433_vm0, %v1060_v8  ;;  %v1066_v8 = vld [vmem:[%s1358_s4 + $0x8] sm:$0xff]  }
  0x35   : > { %553 = vmatprep.mubr.bf16.mxu1 %v1131_v4 }
  0x36   : > { %591 = vperm.xlu1 %1056, %v577_v18  }
  0x3c   : > { %993 = vmatmul.mubr.msk.bf16.gmra.mxu1 %vm433_vm0, %v1061_v10 }
  0x3d   : > { %718 = vmatprep.mubr.bf16.mxu1 %v1131_v4 }
  0xa2   : > { %v406_v19 = vpop.permute.xlu0 %405 }
  0xa4   : > { %v396_v20 = vpop.permute.xlu1 %395 }
  0xa6   : > { %v411_v25 = vpop.permute.xlu0 %410 }
  0xa9   : > { %v401_v28 = vpop.permute.xlu1 %400 }
  0xeb   : > { %v474_v21 = vpop.f32.mrf.mxu0 }
  0xec   : > { %v484_v22 = vpop.f32.mrf.mxu1  ;;  %v475_v37 = vadd.f32 %v474_v21, %v396_v20  ;;  %v1302_v21 = vpop.permute.xlu1 %601 }
  0xed   : > { %v476_v23 = vpop.f32.mrf.mxu0  ;;  %v485_v31 = vadd.f32 %v484_v22, %v406_v19 }
  0xee   : > { %v486_v24 = vpop.f32.mrf.mxu1  ;;  %v477_v34 = vadd.f32 %v476_v23, %v396_v20  ;;  %v493_v48 = vmax.f32 %v475_v37, 0.0  ;;  %v597_v23 = vpop.permute.xlu0 %596 }
  0xef   : > { %v478_v26 = vpop.f32.mrf.mxu0  ;;  %v487_v29 = vadd.f32 %v486_v24, %v406_v19  ;;  %v497_v44 = vmax.f32 %v485_v31, 0.0 }
  0xf0   : > { %v488_v27 = vpop.f32.mrf.mxu1  ;;  %v479_v38 = vadd.f32 %v478_v26, %v401_v28  ;;  %v494_v46 = vmax.f32 %v477_v34, 0.0  ;;  %v592_v26 = vpop.permute.xlu1 %591 }
  0xf1   : > { %v489_v30 = vadd.f32 %v488_v27, %v411_v25  ;;  %v480_v32 = vpop.f32.mrf.mxu0  ;;  %v498_v41 = vmax.f32 %v487_v29, 0.0 }
  0xf2   : > { %v490_v33 = vpop.f32.mrf.mxu1  ;;  %v481_v35 = vadd.f32 %v480_v32, %v401_v28  ;;  %v495_v49 = vmax.f32 %v479_v38, 0.0  ;;  %v587_v31 = vpop.permute.xlu0 %586 }
  0xf3   : > { %v491_v36 = vadd.f32 %v490_v33, %v411_v25  ;;  %v499_v39 = vmax.f32 %v489_v30, 0.0 }
  0xf4   : > { %v545_v40 = vpop.f32.mrf.mxu1  ;;  %v496_v42 = vmax.f32 %v481_v35, 0.0  ;;  %v580_v54 = vpack.c.bf16 %v495_v49, %v493_v48 }
  0xf5   : > { %v500_v43 = vmax.f32 %v491_v36, 0.0  ;;  %v582_v50 = vpack.c.bf16 %v499_v39, %v497_v44  ;;  %v546_v9 = vadd.f32 %v545_v40, %v396_v20 }
  0xf6   : > { %v547_v45 = vpop.f32.mrf.mxu1  ;;  %v581_v52 = vpack.c.bf16 %v496_v42, %v494_v46 }
  0xf7   : > { %v583_v47 = vpack.c.bf16 %v500_v43, %v498_v41  ;;  %v548_v0 = vadd.f32 %v547_v45, %v396_v20  ;;  %v564_v16 = vmax.f32 %v546_v9, 0.0 }
  0xf8   : > { %v549_v51 = vpop.f32.mrf.mxu1 }
  0xf9   : > { %633 = vmatprep.subr.bf16.mxu0 %v583_v47  ;;  %v550_v2 = vadd.f32 %v549_v51, %v401_v28  ;;  %v565_v11 = vmax.f32 %v548_v0, 0.0  ;;  %v1068_v51 = vld [vmem:[%s1360_s6 + $0x8] sm:$0xff]  }
  0xfa   : > { %v551_v53 = vpop.f32.mrf.mxu1  ;;  %634 = vmatpush1.bf16.msra.mxu0 %v582_v50  ;;  %v1067_v50 = vld [vmem:[%s1360_s6] sm:$0xff]  }
  0xfb   : > { %635 = vmatprep.subr.bf16.mxu0 %v581_v52  ;;  %v552_v59 = vadd.f32 %v551_v53, %v401_v28  ;;  %v566_v13 = vmax.f32 %v550_v2, 0.0 }
  0xfc   : > { %v555_v55 = vpop.f32.mrf.mxu1 }
  0xfd   : > { %v556_v62 = vadd.f32 %v555_v55, %v406_v19  ;;  %v567_v5 = vmax.f32 %v552_v59, 0.0  ;;  %v682_v17 = vpack.c.bf16 %v566_v13, %v564_v16 }
  0xfe   : > { %v557_v57 = vpop.f32.mrf.mxu1  ;;  %636 = vmatpush1.bf16.msra.mxu0 %v580_v54 }
  0xff   : > { %v558_v60 = vadd.f32 %v557_v57, %v406_v19  ;;  %v568_v10 = vmax.f32 %v556_v62, 0.0  ;;  %v683_v15 = vpack.c.bf16 %v567_v5, %v565_v11 }
 0x100   : > { %v559_v58 = vpop.f32.mrf.mxu1 }
 0x101   : > { %v560_v61 = vadd.f32 %v559_v58, %v411_v25  ;;  %996 = vmatmul.mubr.msk.bf16.vlgmr.msra.gmra.mxu0 %vm614_vm1, %v1065_v56  ;;  %v569_v6 = vmax.f32 %v558_v60, 0.0 }
 0x102   : > { %v561_v63 = vpop.f32.mrf.mxu1  ;;  %663 = vmatprep.mubr.bf16.mxu0 %v1131_v4 }
 0x103   : > { %v562_v1 = vadd.f32 %v561_v63, %v411_v25  ;;  %v570_v3 = vmax.f32 %v560_v61, 0.0 }
 0x105   : > { %v571_v7 = vmax.f32 %v562_v1, 0.0  ;;  %v684_v14 = vpack.c.bf16 %v570_v3, %v568_v10 }
 0x107   : > { %v685_v12 = vpack.c.bf16 %v571_v7, %v569_v6 }
 0x109   : > { %997 = vmatmul.mubr.msk.bf16.gmra.mxu0 %vm614_vm1, %v1066_v8  ;;  %698 = vmatprep.subr.bf16.mxu1 %v685_v12 }
 0x10a   : > { %699 = vmatpush1.bf16.msra.mxu1 %v684_v14  ;;  %803 = vmatprep.mubr.bf16.mxu0 %v1131_v4 }
 0x10b   : > { %700 = vmatprep.subr.bf16.mxu1 %v683_v15 }
 0x10e   : > { %701 = vmatpush1.bf16.msra.mxu1 %v682_v17 }
 0x111   : > { %998 = vmatmul.mubr.msk.bf16.vlgmr.msra.gmra.mxu1 %vm614_vm1, %v1065_v56 }
 0x112   : > { %728 = vmatprep.mubr.bf16.mxu1 %v1131_v4 }
 0x119   : > { %999 = vmatmul.mubr.msk.bf16.gmra.mxu1 %vm614_vm1, %v1066_v8 }
 0x1c1   : > { %v655_v18 = vpop.f32.mrf.mxu0 }
 0x1c2   : > { %v656_v41 = vadd.f32 %v655_v18, %v587_v31 }
 0x1c3   : > { %v657_v19 = vpop.f32.mrf.mxu0 }
 0x1c4   : > { %v658_v34 = vadd.f32 %v657_v19, %v587_v31  ;;  %v674_v48 = vmax.f32 %v656_v41, 0.0  ;;  %v856_v41 = vlaneseq }
 0x1c5   : > { %v659_v20 = vpop.f32.mrf.mxu0 }
 0x1c6   : > { %v660_v36 = vadd.f32 %v659_v20, %v592_v26  ;;  %v675_v43 = vmax.f32 %v658_v34, 0.0  ;;  %vm870_vm2 = vcmp.lt.s32.totalorder %v856_v41, 256 }
 0x1c7   : > { %v661_v22 = vpop.f32.mrf.mxu0 }
 0x1c8   : > { %v662_v28 = vadd.f32 %v661_v22, %v592_v26  ;;  %v676_v45 = vmax.f32 %v660_v36, 0.0 }
 0x1c9   : > { %v665_v24 = vpop.f32.mrf.mxu0 }
 0x1ca   : > { %v666_v32 = vadd.f32 %v665_v24, %v597_v23  ;;  %v677_v38 = vmax.f32 %v662_v28, 0.0  ;;  %v751_v49 = vpack.c.bf16 %v676_v45, %v674_v48 }
 0x1cb   : > { %v667_v25 = vpop.f32.mrf.mxu0 }
 0x1cc   : > { %v668_v29 = vadd.f32 %v667_v25, %v597_v23  ;;  %v678_v42 = vmax.f32 %v666_v32, 0.0  ;;  %v752_v47 = vpack.c.bf16 %v677_v38, %v675_v43 }
 0x1cd   : > { %v669_v27 = vpop.f32.mrf.mxu0 }
 0x1ce   : > { %v670_v30 = vadd.f32 %v669_v27, %v1302_v21  ;;  %v679_v39 = vmax.f32 %v668_v29, 0.0 }
 0x1cf   : > { %v671_v33 = vpop.f32.mrf.mxu0 }
 0x1d0   : > { %v672_v35 = vadd.f32 %v671_v33, %v1302_v21  ;;  %v680_v37 = vmax.f32 %v670_v30, 0.0 }
 0x1d1   : > { %v720_v52 = vpop.f32.mrf.mxu1 }
 0x1d2   : > { %v681_v40 = vmax.f32 %v672_v35, 0.0  ;;  %v753_v46 = vpack.c.bf16 %v680_v37, %v678_v42  ;;  %v721_v58 = vadd.f32 %v720_v52, %v587_v31 }
 0x1d3   : > { %v722_v53 = vpop.f32.mrf.mxu1 }
 0x1d4   : > { %v754_v44 = vpack.c.bf16 %v681_v40, %v679_v39  ;;  %v723_v60 = vadd.f32 %v722_v53, %v587_v31  ;;  %v739_v1 = vmax.f32 %v721_v58, 0.0  ;;  %v1132_v39 = vmov 1966171168  }
 0x1d5   : > { %v724_v54 = vpop.f32.mrf.mxu1  ;;  %v854_v40 = vunpack.c.l.s4 %v1132_v39 }
 0x1d6   : > { %783 = vmatprep.subr.bf16.mxu0 %v754_v44  ;;  %v725_v59 = vadd.f32 %v724_v54, %v592_v26  ;;  %v740_v3 = vmax.f32 %v723_v60, 0.0 }
 0x1d7   : > { %784 = vmatpush1.bf16.msra.mxu0 %v753_v46  ;;  %v726_v55 = vpop.f32.mrf.mxu1  ;;  %v855_v46 = vunpack.c.0.s8 %v854_v40 }
 0x1d8   : > { %785 = vmatprep.subr.bf16.mxu0 %v752_v47  ;;  %v727_v62 = vadd.f32 %v726_v55, %v592_v26  ;;  %v741_v2 = vmax.f32 %v725_v59, 0.0  ;;  %v857_v47 = vshrl.u32 %v856_v41, 7 }
 0x1d9   : > { %v730_v56 = vpop.f32.mrf.mxu1 }
 0x1da   : > { %v731_v63 = vadd.f32 %v730_v56, %v597_v23  ;;  %v742_v6 = vmax.f32 %v727_v62, 0.0 }
 0x1db   : > { %786 = vmatpush1.bf16.msra.mxu0 %v751_v49  ;;  %v732_v57 = vpop.f32.mrf.mxu1 }
 0x1dc   : > { %v733_v7 = vadd.f32 %v732_v57, %v597_v23  ;;  %v743_v10 = vmax.f32 %v731_v63, 0.0 }
 0x1dd   : > { %v734_v0 = vpop.f32.mrf.mxu1 }
 0x1de   : > { %1002 = vmatmul.mubr.msk.bf16.vlgmr.msra.gmra.mxu0 %vm614_vm1, %v1067_v50  ;;  %v735_v13 = vadd.f32 %v734_v0, %v1302_v21  ;;  %v744_v18 = vmax.f32 %v733_v7, 0.0 }
 0x1df   : > { %813 = vmatprep.mubr.bf16.mxu0 %v1131_v4  ;;  %v736_v11 = vpop.f32.mrf.mxu1 }
 0x1e0   : > { %v737_v19 = vadd.f32 %v736_v11, %v1302_v21  ;;  %v745_v25 = vmax.f32 %v735_v13, 0.0 }
 0x1e2   : > { %v746_v27 = vmax.f32 %v737_v19, 0.0 }
 0x1e6   : > { %1003 = vmatmul.mubr.msk.bf16.gmra.mxu0 %vm614_vm1, %v1068_v51  ;;  %v858_v51 = vsub.s32 %v855_v46, %v857_v47 }
 0x29e   : > { %v805_v61 = vpop.f32.mrf.mxu0 }
 0x29f   : > { %v824_v8 = vmul.f32 %v805_v61, %v739_v1 }
 0x2a0   : > { %v807_v4 = vpop.f32.mrf.mxu0 }
 0x2a1   : > { %v825_v14 = vmul.f32 %v807_v4, %v740_v3 }
 0x2a2   : > { %v809_v5 = vpop.f32.mrf.mxu0 }
 0x2a3   : > { %v826_v9 = vmul.f32 %v809_v5, %v741_v2 }
 0x2a4   : > { %v811_v12 = vpop.f32.mrf.mxu0 }
 0x2a5   : > { %v832_v15 = vadd.f32 %v826_v9, %v824_v8  ;;  %v827_v16 = vmul.f32 %v811_v12, %v742_v6 }
 0x2a6   : > { %v815_v17 = vpop.f32.mrf.mxu0 }
 0x2a7   : > { %v841_v20 = vadd.f32 %v827_v16, %v825_v14  ;;  %v828_v22 = vmul.f32 %v815_v17, %v743_v10 }
 0x2a8   : > { %v817_v24 = vpop.f32.mrf.mxu0 }
 0x2a9   : > { %v829_v26 = vmul.f32 %v817_v24, %v744_v18  ;;  %v833_v28 = vadd.f32 %v832_v15, %v828_v22 }
 0x2aa   : > { %v819_v23 = vpop.f32.mrf.mxu0 }
 0x2ab   : > { %v830_v29 = vmul.f32 %v819_v23, %v745_v25  ;;  %v842_v31 = vadd.f32 %v841_v20, %v829_v26 }
 0x2ac   : > { %v821_v30 = vpop.f32.mrf.mxu0 }
 0x2ad   : > { %v834_v32 = vadd.f32 %v833_v28, %v830_v29  ;;  %v831_v33 = vmul.f32 %v821_v30, %v746_v27 }
 0x2af   : > { %v835_v34 = vrot.slane %v834_v32, 4  ;;  %v843_v35 = vadd.f32 %v842_v31, %v831_v33 }
 0x2b1   : > { %v836_v36 = vadd.f32 %v835_v34, %v834_v32  ;;  %v844_v37 = vrot.slane %v843_v35, 4 }
 0x2b3   : > { %v837_v38 = vrot.slane %v836_v36, 2  ;;  %v845_v21 = vadd.f32 %v844_v37, %v843_v35 }
 0x2b5   : > { %v838_v42 = vadd.f32 %v837_v38, %v836_v36  ;;  %v846_v43 = vrot.slane %v845_v21, 2 }
 0x2b7   : > { %v839_v44 = vrot.slane %v838_v42, 1  ;;  %v847_v45 = vadd.f32 %v846_v43, %v845_v21 }
 0x2b9   : > { %v848_v48 = vrot.slane %v847_v45, 1  ;;  %v840_v49 = vadd.f32 %v839_v44, %v838_v42 }
 0x2bb   : > { %v849_v50 = vadd.f32 %v848_v48, %v847_v45 }
 0x2bd   : > { %v852_v52 = vcombine.low %v840_v49, %v849_v50 }
 0x2bf   : > { %v859_v53 = vrot.slane %v852_v52, %v858_v51 }
 0x2c1   : > { %v866_v54 = vrot.slane %v859_v53, %v858_v51 }
 0x2c3   : > { %872 = vst.msk [vmem:[%s376_s22] sm:$0x3] %vm870_vm2, %v866_v54 }
 0x2c4   : > { %1082 = shalt.err (!%p1079_p5)
}
 0x2c5   : > { %s1083_s18 = scalar_lea.hbm %s886_s9, 32  ;;  %s1087_s20 = scalar_lea.hbm %s1361_s7, 64 }
 0x2c6   : > { %p1084_p7 = scmp.ne.s32.totalorder %s886_s9, %s1083_s18  ;;  %p1088_p12 = scmp.lt.s32.totalorder %s886_s9, %s1361_s7 }
 0x2c7   : > { %p1089_p13 = scmp.lt.s32.totalorder %s1087_s20, %s1083_s18 }
 0x2c8   : > { %p1085_p10 = pnand %p1084_p7, %p1216_p6 }
 0x2c9   : > { %p1090_p0 = por %p1089_p13, %p1088_p12 }
 0x2ca   : > { %p1086_p11 = pneg %p1085_p10 }
 0x2cc   : > { %p1091_p9 = pnand %p1090_p0, %p1086_p11 }
 0x2ce   : > { %1094 = shalt.err (!%p1091_p9)
}
 0x2cf   : > { %1014 = dma.vmem_to_hbm [thread:$0]  (%p1216_p6), %s889_s23, 32, %s886_s9, %s874_s14  }
 0x2d0 PF: > { %s900_s29 = sand.u32 1, %s1117_s24   ;;  %p1366_p1 = scmp.ge.s32.totalorder %s1129_s27, 2 }
 0x2d1   : > { %s901_s8 = scalar_lea.sflag [#allocation5], %s900_s29 }
 0x2d2   : > { %p1017_p2 = pnand %p1366_p1, %p1220_p8 }
 0x2d4   : > { %p1018_p3 = pneg %p1017_p2 }
 0x2d6   : > { %1112 = dma.done.wait (%p1018_p3), %s901_s8, 32  }
 0x2d7   : > { %1114 = vsyncadd (%p1018_p3), %s901_s8, 4294967264  ;;  %p17_p9 = scmp.ge.s32.totalorder %s1197_s30, 4   ;;  %s1367_s24 = smov %s1121_s25 }
 0x2d8   : > { %s1368_s25 = smov %s1125_s26  ;;  %s1369_s26 = smov %s1210_s10 }
 0x2d9   : > { %s1370_s27 = smov %s1197_s30  ;;  %19 = sbr.rel (!%p17_p9) target bundleno = 3 (0x3), region = 172 }
 0x2de   :  { %906 = vsyncpa [#allocation5], 1 }
 0x2df   :  { %908 = vsyncpa [#allocation5 + $0x1], 1 }

</bundles_post_ra>
